<compile_context>
chip_gen: v7x
topology: tpu7x:2x2x1
jax: 0.10.0
libtpu: 0.0.40
codegen_flags: <defaults>
</compile_context>

<pallas_src>
import functools

import jax
import jax.numpy as jnp
import numpy as np
from jax.experimental import pallas as pl
from jax.experimental.pallas import tpu as pltpu

CHANNEL = 250          # logical channel count of the PyTorch model
CP = 256               # lane-aligned padded channel count used inside the kernel
NUM_CLASSES = 4


# ----------------------------------------------------------------------------- roll probe
_ROLL_FWD_CACHE = None


def _roll_probe_kernel(x_ref, o_ref):
    o_ref[...] = pltpu.roll(x_ref[...], shift=1, axis=0)


def _roll_convention_forward():
    """True iff pltpu.roll(x, shift=1, axis=0)[i] == x[i-1] (jnp.roll convention).

    One-time, cached hardware probe so the segment masks built around the XLU rotates
    stay numerically correct regardless of the Mosaic rotate direction convention.
    """
    global _ROLL_FWD_CACHE
    if _ROLL_FWD_CACHE is None:
        x = jax.lax.broadcasted_iota(jnp.float32, (8, 128), 0)
        y = pl.pallas_call(
            _roll_probe_kernel,
            out_shape=jax.ShapeDtypeStruct((8, 128), jnp.float32),
            in_specs=[pl.BlockSpec(memory_space=pltpu.MemorySpace.VMEM)],
            out_specs=pl.BlockSpec(memory_space=pltpu.MemorySpace.VMEM),
        )(x)
        _ROLL_FWD_CACHE = bool(np.asarray(y)[1, 0] == 0.0)
    return _ROLL_FWD_CACHE


# ----------------------------------------------------------------------------- kernel
def dpcnn_kernel(x_ref, wr_ref, br_ref, wc_hbm_ref, bc_ref, wl_ref, bl_ref,
                 o_ref, tmp_ref, wc_ref, wc_sem, *, roll_fwd):
    B, S, E = x_ref.shape
    H0 = S - 2
    f32, bf16 = jnp.float32, jnp.bfloat16

    # Kick off the conv3-weight HBM->VMEM DMA immediately so the ~384 KiB transfer
    # overlaps the region-embedding matmul instead of sitting serially before any compute.
    wc_copy = pltpu.make_async_copy(wc_hbm_ref, wc_ref, wc_sem)
    wc_copy.start()

    br = br_ref[...]                      # (1, CP) f32
    bc = bc_ref[...]                      # (1, CP) f32
    bl = bl_ref[...]                      # (1, 4)  f32

    def seg_row(n, hseg):
        # row index within each batch segment of height hseg (stacked layout)
        return jax.lax.broadcasted_iota(jnp.int32, (n, 1), 0) % hseg

    def shift_rows(y, delta):
        # Circular row shift: result[i] = y[(i + delta) % n].  Wrapped rows (including
        # cross-batch-segment leakage) are zeroed by the masks at the call sites.
        # Sublane-aligned operands use the XLU rotate; the tiny sub-8-row tail keeps
        # the slice+concat path (avoids odd-shape rotate lowering corner cases).
        n = y.shape[0]
        if n % 8 == 0:
            amt = (-delta) % n if roll_fwd else delta % n
            return pltpu.roll(y, shift=amt, axis=0)
        d = delta % n
        return jnp.concatenate([y[d:, :], y[:d, :]], axis=0)

    def conv3(y, hseg):
        # y: (B*hseg, CP) f32, already ReLU'd.  Fused 3-tap conv:
        #   out[h] = y[h-1] @ Wc0 + y[h] @ Wc1 + y[h+1] @ Wc2 + bc
        # with zeros outside each batch segment (== nn.ZeroPad2d((0, 0, 1, 1))).
        # TODO(synk): hold wc resident in MXU staging (pltpu.matmul_push_rhs /
        # matmul_acc_lhs / matmul_pop) so the 768x256 weight is pushed once instead of
        # once per conv3 call; deferred because addressed-accumulator staging is not
        # portable across v5e/v6e (MRF result FIFO) and risks lowering failures there.
        n = y.shape[0]
        r = seg_row(n, hseg)
        y_dn = jnp.where(r == 0, 0.0, shift_rows(y, -1))
        y_up = jnp.where(r == hseg - 1, 0.0, shift_rows(y, +1))
        op = jnp.concatenate([y_dn, y, y_up], axis=1).astype(bf16)   # (n, 3*CP)
        return jnp.dot(op, wc_ref[...], preferred_element_type=f32) + bc

    def pool(y, hseg):
        # ZeroPad2d((0, 0, 0, 1)) + MaxPool2d((3, 1), stride=2), per batch segment.
        n = y.shape[0]
        r = seg_row(n, hseg)
        u1 = jnp.where(r == hseg - 1, 0.0, shift_rows(y, +1))
        u2 = jnp.where(r >= hseg - 2, 0.0, shift_rows(y, +2))
        tmp_ref[0:n, :] = jnp.maximum(jnp.maximum(y, u1), u2)
        # stride-2 sublane read picks window starts 0, 2, ... of every batch segment
        return tmp_ref[pl.ds(0, n // 2, stride=2), :], hseg // 2

    relu = lambda v: jnp.maximum(v, 0.0)

    # --- region embedding: Conv2d(1, C, (3, E)) fused into ONE (B*H0, 3E) x (3E, CP)
    #     matmul (single MXU weight push / result pop).  Overlaps the wc DMA above. ---
    taps = []
    for k in range(3):
        taps.append(jnp.concatenate([x_ref[b][k:k + H0, :] for b in range(B)], axis=0))
    lhs = jnp.concatenate(taps, axis=1).astype(bf16)              # (B*H0, 3*E)
    y = jnp.dot(lhs, wr_ref[...], preferred_element_type=f32) + br

    # conv3 weight is needed from here on.
    wc_copy.wait()

    h = H0
    y = conv3(relu(y), h)
    y = conv3(relu(y), h)

    # "while x.size()[-2] > 2": trip count is static at trace time.
    while h > 2:
        px, h = pool(y, h)
        y = conv3(relu(px), h) + px

    # --- final linear.  y: (B*2, CP) stacked.  PyTorch's .view(batch, 2*C) on NCHW
    #     flattens as index c*2 + h; that permutation is folded into wl (row h*CP + c). ---
    tmp_ref[0:2 * B, :] = y
    flat = jnp.concatenate([tmp_ref[pl.ds(0, B, stride=2), :],    # h = 0 row of each batch
                            tmp_ref[pl.ds(1, B, stride=2), :]],   # h = 1 row of each batch
                           axis=1).astype(bf16)                   # (B, 2*CP)
    o_ref[...] = jnp.dot(flat, wl_ref[...], preferred_element_type=f32) + bl


# ----------------------------------------------------------------------------- wrapper
def dpcnn_prepare_params(w_region, b_region, w_conv3, b_conv3, w_lin, b_lin):
    """One-time weight reformatting: transpose / zero-pad 250->256 / bf16 cast."""
    C, pad = CHANNEL, CP - CHANNEL
    f32, bf16 = jnp.float32, jnp.bfloat16
    E = w_region.shape[-1]

    # Conv2d(1, C, (3, E)): tap k multiplies x[h + k]  ->  fused (3*E, CP) bf16
    wr = jnp.transpose(w_region[:, 0], (1, 2, 0))                    # (3, E, C)
    wr = jnp.pad(wr, ((0, 0), (0, 0), (0, pad)))
    wr = wr.reshape(3 * E, CP).astype(bf16)
    br = jnp.pad(b_region, (0, pad)).reshape(1, CP).astype(f32)

    # Conv2d(C, C, (3, 1)): three taps stacked along K  ->  (3*CP, CP) bf16
    wc = jnp.transpose(w_conv3[:, :, :, 0], (2, 1, 0))               # (3, C_in, C_out)
    wc = jnp.pad(wc, ((0, 0), (0, pad), (0, pad)))
    wc = wc.reshape(3 * CP, CP).astype(bf16)
    bc = jnp.pad(b_conv3, (0, pad)).reshape(1, CP).astype(f32)

    # Linear(2C, 4): PyTorch flat index c*2 + h  ->  kernel row index h*CP + c.
    wl = jnp.transpose(w_lin.reshape(NUM_CLASSES, C, 2), (2, 1, 0))  # (2, C, 4)
    wl = jnp.pad(wl, ((0, 0), (0, pad), (0, 0)))
    wl = wl.reshape(2 * CP, NUM_CLASSES).astype(bf16)
    bl = b_lin.reshape(1, NUM_CLASSES).astype(f32)
    return wr, br, wc, bc, wl, bl


def dpcnn_forward(x_nchw, params):
    wr, br, wc, bc, wl, bl = params
    B, _, S, E = x_nchw.shape

    # The stacked stride-2 pooling (and the final 2-row flatten) require the height chain
    # S-2 -> ... -> 2 to stay even; this also guards the latent PyTorch issue where the
    # `while h > 2` loop can land on 1 row and break .view(batch, 2*C).
    h = S - 2
    assert h >= 2 and h % 2 == 0, f"unsupported seq_len {S}: region height {h}"
    while h > 2:
        assert h % 2 == 0, f"unsupported seq_len {S}: pooling hits odd height {h}"
        h //= 2
    assert h == 2

    x = x_nchw[:, 0, :, :].astype(jnp.float32)                       # (B, S, E)
    vmem = lambda: pl.BlockSpec(memory_space=pltpu.MemorySpace.VMEM)
    kernel = functools.partial(dpcnn_kernel, roll_fwd=_roll_convention_forward())
    return pl.pallas_call(
        kernel,
        out_shape=jax.ShapeDtypeStruct((B, NUM_CLASSES), jnp.float32),
        in_specs=[vmem(), vmem(), vmem(),
                  pl.BlockSpec(memory_space=pl.ANY),                 # wc: manual async DMA
                  vmem(), vmem(), vmem()],
        out_specs=vmem(),
        scratch_shapes=[
            pltpu.VMEM((B * (S - 2), CP), jnp.float32),              # pool / flatten scratch
            pltpu.VMEM((3 * CP, CP), jnp.bfloat16),                  # conv3 weight (prefetched)
            pltpu.SemaphoreType.DMA(()),                             # its DMA semaphore
        ],
    )(x, wr, br, wc, bc, wl, bl)


# ----------------------------------------------------------------------------- reference
def dpcnn_reference(x, w_region, b_region, w_conv3, b_conv3, w_lin, b_lin):
    # Pure-JAX mirror of the PyTorch forward (NCHW) — verification only.
    dn = ("NCHW", "OIHW", "NCHW")
    hi = jax.lax.Precision.HIGHEST

    def conv(inp, w, b):
        y = jax.lax.conv_general_dilated(inp, w, (1, 1), "VALID",
                                         dimension_numbers=dn, precision=hi)
        return y + b[None, :, None, None]

    pad_c = lambda y: jnp.pad(y, ((0, 0), (0, 0), (1, 1), (0, 0)))
    pad_p = lambda y: jnp.pad(y, ((0, 0), (0, 0), (0, 1), (0, 0)))
    mpool = lambda y: jax.lax.reduce_window(y, -jnp.inf, jax.lax.max,
                                            (1, 1, 3, 1), (1, 1, 2, 2), "VALID")

    x = conv(x, w_region, b_region)
    x = conv(jnp.maximum(pad_c(x), 0.0), w_conv3, b_conv3)
    x = conv(jnp.maximum(pad_c(x), 0.0), w_conv3, b_conv3)
    while x.shape[2] > 2:
        px = mpool(pad_p(x))
        x = conv(jnp.maximum(pad_c(px), 0.0), w_conv3, b_conv3) + px
    v = x.reshape(x.shape[0], 2 * CHANNEL)
    return jnp.dot(v, w_lin.T, precision=hi) + b_lin


if __name__ == "__main__":
    B, S, E = 2, 10, 16   # batch=2, seq_len=10, word_embedding_dimension=16
    C = CHANNEL
    key = jax.random.PRNGKey(0)
    ks = jax.random.split(key, 7)
    x = jax.random.normal(ks[0], (B, 1, S, E), jnp.float32)
    w_region = jax.random.normal(ks[1], (C, 1, 3, E), jnp.float32) * 0.05
    b_region = jax.random.normal(ks[2], (C,), jnp.float32) * 0.05
    w_conv3 = jax.random.normal(ks[3], (C, C, 3, 1), jnp.float32) * 0.05
    b_conv3 = jax.random.normal(ks[4], (C,), jnp.float32) * 0.05
    w_lin = jax.random.normal(ks[5], (NUM_CLASSES, 2 * C), jnp.float32) * 0.05
    b_lin = jax.random.normal(ks[6], (NUM_CLASSES,), jnp.float32) * 0.05

    # One-time weight layout/cast (hoisted out of the per-call forward path).
    params = jax.block_until_ready(
        dpcnn_prepare_params(w_region, b_region, w_conv3, b_conv3, w_lin, b_lin))

    out = jax.block_until_ready(dpcnn_forward(x, params))

    ref = dpcnn_reference(x, w_region, b_region, w_conv3, b_conv3, w_lin, b_lin)
    # Tolerance 2e-2 documented: MXU operands are bf16 (accumulation in f32).
    np.testing.assert_allclose(np.asarray(out), np.asarray(ref), rtol=2e-2, atol=2e-2)
    print("KERNEL_OK")
</pallas_src>

<mosaic_0001>
module attributes {stable_mosaic.version = 11 : i64} {
  func.func @_roll_probe_kernel(%arg0: memref<8x128xf32, #tpu.memory_space<vmem>>, %arg1: memref<8x128xf32, #tpu.memory_space<vmem>>) attributes {dimension_semantics = [], scalar_prefetch = 0 : i64, scratch_operands = 0 : i64, tpu.core_type = #tpu.core_type<tc>} {
    %c0 = arith.constant 0 : index
    %c0_0 = arith.constant 0 : index
    %0 = vector.load %arg0[%c0, %c0_0] : memref<8x128xf32, #tpu.memory_space<vmem>>, vector<8x128xf32>
    %c1_i32 = arith.constant 1 : i32
    %1 = tpu.dynamic_rotate %0 by %c1_i32 dim 0 : vector<8x128xf32>, i32 -> vector<8x128xf32>
    %c0_1 = arith.constant 0 : index
    %c0_2 = arith.constant 0 : index
    %2 = vector.load %arg1[%c0_1, %c0_2] : memref<8x128xf32, #tpu.memory_space<vmem>>, vector<8x128xf32>
    tpu.vector_store %arg1[%c0_1, %c0_2], %1 {strides = array<i32>} : memref<8x128xf32, #tpu.memory_space<vmem>>, vector<8x128xf32>,
    return
  }
}

</mosaic_0001>

<bundles_post_ra>
// kernel: tpu_custom_call.1
= control target key start
LH: loop header
LB: loop body
LE: loop exit
PB: predicated region body
PF: predicated region fallthrough
CT: control target
= control target key end

     0   :  { %6 = vsyncpa [#allocation3], 0  ;;  %s125_s0 = inlined_call_operand.hbm [shape: f32[8,128], index: 0, kind: input, shape index: {}]   ;;  %s126_s1 = inlined_call_operand.hbm [shape: f32[8,128], index: 1, kind: output, shape index: {}]  }
   0x1   :  { %7 = vsyncpa [#allocation4], 0  ;;  %s89_s6 = smov [#allocation2]   ;;  %s41_s10 = scalar_lea.hbm %s125_s0, 128 }
   0x2   :  { %s14_s7 = sshll.u32 %s89_s6, 4  ;;  %p42_p0 = scmp.ne.s32.totalorder %s125_s0, %s41_s10  ;;  %s15_s7 = int_to_ptr.vmem [resolvable:$true] %s14_s7 }
   0x3   :  { %p45_p1 = scmp.lt.u32.totalorder %s41_s10, %s125_s0 }
   0x5   :  { %p47_p2 = pnand %p45_p1, %p42_p0 }
   0x7   :  { %50 = shalt.err (!%p47_p2)
}
   0x8   :  { %s51_s15 = scalar_lea.vmem %s15_s7, 128  ;;  %p56_p4 = scmp.lt.s32.totalorder %s15_s7, %s15_s7 }
   0x9   :  { %p52_p3 = scmp.ne.s32.totalorder %s15_s7, %s51_s15  ;;  %p57_p5 = scmp.lt.s32.totalorder %s51_s15, %s51_s15 }
   0xb   :  { %p58_p6 = por %p57_p5, %p56_p4 }
   0xd   :  { %p59_p7 = pnand %p58_p6, %p52_p3 }
   0xf   :  { %62 = shalt.err (!%p59_p7)
}
  0x10   :  { %17 = dma.hbm_to_vmem [thread:$0]  %s125_s0, 128, %s15_s7, [#allocation3]  }
  0x11   :  { %85 = dma.done.wait [#allocation3], 128  }
  0x12   :  { %86 = vsyncadd [#allocation3], 4294967168  ;;  %s90_s18 = smov [#allocation5]   ;;  %v21_v0 = vld [vmem:[#allocation2] sm:$0xff] }
  0x13   :  { %s30_s19 = sshll.u32 %s90_s18, 4  ;;  %v22_v1 = vrot.slane %v21_v0, 7  ;;  %s31_s19 = int_to_ptr.vmem [resolvable:$true] %s30_s19 }
  0x14   :  { %s63_s20 = scalar_lea.vmem %s31_s19, 128  ;;  %p68_p9 = scmp.lt.s32.totalorder %s31_s19, %s31_s19 }
  0x15   :  { %23 = vst [vmem:[#allocation5] sm:$0xff] %v22_v1  ;;  %p64_p8 = scmp.ne.s32.totalorder %s31_s19, %s63_s20  ;;  %p69_p10 = scmp.lt.s32.totalorder %s63_s20, %s63_s20 }
  0x17   :  { %p70_p11 = por %p69_p10, %p68_p9 }
  0x19   :  { %p71_p12 = pnand %p70_p11, %p64_p8 }
  0x1b   :  { %74 = shalt.err (!%p71_p12)
}
  0x1c   :  { %s75_s23 = scalar_lea.hbm %s126_s1, 128 }
  0x1d   :  { %p76_p13 = scmp.ne.s32.totalorder %s126_s1, %s75_s23  ;;  %p79_p0 = scmp.lt.u32.totalorder %s75_s23, %s126_s1 }
  0x1f   :  { %p81_p1 = pnand %p79_p0, %p76_p13 }
  0x21   :  { %84 = shalt.err (!%p81_p1)
}
  0x22   :  { %33 = dma.vmem_to_hbm [thread:$0]  %s31_s19, 128, %s126_s1, [#allocation4]  }
  0x23   :  { %87 = dma.done.wait [#allocation4], 128  }
  0x24   :  { %88 = vsyncadd [#allocation4], 4294967168 }
  0x25   :  { %37 = vsyncpa [#allocation3], 1 }
  0x26   :  { %38 = vsyncpa [#allocation4], 1 }

</bundles_post_ra>
